<compile_context>
chip_gen: v7x
topology: tpu7x:2x2x1
jax: 0.10.0
libtpu: 0.0.40
codegen_flags: <defaults>
</compile_context>

<pallas_src>
import functools

import jax
import jax.numpy as jnp
from jax import lax
from jax.experimental import pallas as pl
from jax.experimental.pallas import tpu as pltpu


def _pad_amounts(L, kernel_size):
    """Mirrors the PyTorch module's (stride-independent) padding logic."""
    left = (kernel_size - 1) // 2
    l_out_check = L + 2 * left - kernel_size + 1
    end_rep = left if l_out_check == L else left + 1
    return left, end_rep


# ---------------------------------------------------------------------------
# Kernel A (row path): channels on lanes.  Grid = (B, C-tiles); block =
# (1, L, c_tile).  Output rows are produced `chunk` at a time: one span load
# per chunk, k-tap sum built from shifted slices of the span value so the
# accumulator never round-trips through VMEM.
# ---------------------------------------------------------------------------
def _ma_rows_kernel(x_ref, o_ref, *, k, left, seq_len, chunk, a_start, n_full):
    inv_k = 1.0 / k
    out_dtype = o_ref.dtype

    def row_sum(t):
        """f32 window sum for output row `t` (static), with edge clamping."""
        lo, hi = t - left, t - left + k - 1
        lo_c, hi_c = max(lo, 0), min(hi, seq_len - 1)
        s = jnp.sum(x_ref[0, lo_c:hi_c + 1, :].astype(jnp.float32),
                    axis=0, keepdims=True)
        if lo_c - lo:     # replicated first row
            s = s + float(lo_c - lo) * x_ref[0, 0:1, :].astype(jnp.float32)
        if hi - hi_c:     # replicated last row
            s = s + float(hi - hi_c) * x_ref[0, seq_len - 1:seq_len, :].astype(
                jnp.float32)
        return s

    # Leading rows: windows clipped on the left + rows skipped to align stores.
    if a_start > 0:
        lead = jnp.concatenate([row_sum(t) for t in range(a_start)], axis=0)
        o_ref[0, 0:a_start, :] = (lead * inv_k).astype(out_dtype)

    # Bulk rows, `chunk` at a time (vreg-resident accumulator).
    span_rows = chunk + k - 1
    span_aligned = (a_start - left) % 8 == 0

    def body(i, carry):
        s0 = (a_start - left) + i * chunk
        if span_aligned:
            s0 = pl.multiple_of(s0, 8)
        span = x_ref[0, pl.ds(s0, span_rows), :].astype(jnp.float32)
        acc = span[0:chunk]
        for j in range(1, k):                      # static unroll over taps;
            acc = acc + span[j:j + chunk]          # in-register shifted adds
        dst = pl.multiple_of(a_start + i * chunk, 8)
        o_ref[0, pl.ds(dst, chunk), :] = (acc * inv_k).astype(out_dtype)
        return carry

    if n_full > 0:
        lax.fori_loop(0, n_full, body, 0)

    # Trailing rows: bulk remainder + windows clipped on the right.
    t0 = a_start + n_full * chunk
    if t0 < seq_len:
        trail = jnp.concatenate([row_sum(t) for t in range(t0, seq_len)], axis=0)
        o_ref[0, t0:seq_len, :] = (trail * inv_k).astype(out_dtype)


# ---------------------------------------------------------------------------
# Kernel B (lane path): sequence on lanes (small C).  The wrapper transposes
# x to (B, C, L) so every vreg lane carries useful data; the padded series and
# the k-tap sum are built entirely from values (lane shifts on the XLU) --
# no VMEM scratch, no accumulator round-trip, full lane occupancy.
# ---------------------------------------------------------------------------
def _ma_lanes_kernel(x_ref, o_ref, *, k, left):
    v = x_ref[0]                                   # (C, L)
    C, L = v.shape
    end_rep = k - 1 - left
    parts = []
    if left > 0:
        parts.append(jnp.broadcast_to(v[:, 0:1], (C, left)))
    parts.append(v)
    if end_rep > 0:
        parts.append(jnp.broadcast_to(v[:, L - 1:L], (C, end_rep)))
    xp = jnp.concatenate(parts, axis=1) if len(parts) > 1 else v
    xp = xp.astype(jnp.float32)                    # up-cast once (bf16 inputs)
    acc = xp[:, 0:L]
    for j in range(1, k):                          # static unroll over taps
        acc = acc + xp[:, j:j + L]
    o_ref[0] = (acc * (1.0 / k)).astype(o_ref.dtype)


def moving_avg(x, kernel_size, stride=1):
    """x: (B, L, C) float array.  Returns (B, L_out, C)."""
    B, L, C = x.shape
    k = int(kernel_size)
    left, end_rep = _pad_amounts(L, k)
    L_pad = L + left + end_rep                     # always L + k - 1
    L_out = (L_pad - k) // stride + 1

    itemsize = jnp.dtype(x.dtype).itemsize
    pack = max(1, 4 // itemsize)                   # sublane packing factor
    align = 8 * pack

    def _round_up(a, m):
        return -(-a // m) * m

    # Layout choice (review: small C => lane-dense layout via wrapper transpose).
    lane_path = (C <= 32 and
                 _round_up(C, 8) * _round_up(L_pad, 128) * 4 <= 64 * 1024)

    if lane_path:
        xt = jnp.transpose(x, (0, 2, 1))           # (B, C, L): lanes = sequence
        kern = functools.partial(_ma_lanes_kernel, k=k, left=left)
        yt = pl.pallas_call(
            kern,
            out_shape=jax.ShapeDtypeStruct((B, C, L), x.dtype),
            grid_spec=pltpu.PrefetchScalarGridSpec(
                num_scalar_prefetch=0,
                grid=(B,),
                in_specs=[pl.BlockSpec((1, C, L), lambda b: (b, 0, 0))],
                out_specs=pl.BlockSpec((1, C, L), lambda b: (b, 0, 0)),
            ),
            compiler_params=pltpu.CompilerParams(
                dimension_semantics=("parallel",)),
        )(xt)
        y = jnp.transpose(yt, (0, 2, 1))           # back to (B, L, C)
    else:
        # Channel (lane) tile sizing, kept under a conservative per-step VMEM
        # budget that fits every generation's scoped default (v5e/v6e/v7x).
        if C <= 256:
            c_tile = C                             # full lane dim is always legal
        else:
            c_tile = min(512, (C // 128) * 128)
            budget = 12 * 1024 * 1024              # ~2x double-buffered in + out
            per_lane = 4 * L * itemsize
            while c_tile > 128 and c_tile * per_lane > budget:
                c_tile -= 128
            if B * pl.cdiv(C, c_tile) < 2 and c_tile > 128:
                c_tile = max(128, ((c_tile // 2) // 128) * 128)  # feed both TCs

        chunk = align if c_tile >= 512 else 2 * align

        # Static partition of the L output rows:
        #   [0, a_start)                 left-boundary / alignment rows (unrolled)
        #   [a_start, a_start+n*chunk)   full chunks (fori_loop, vreg accumulator)
        #   [a_start+n*chunk, L)         remainder + right-boundary rows (unrolled)
        right = k - 1 - left
        bulk_lo = min(left, L)
        bulk_hi = min(L, max(bulk_lo, L - right))
        a_start = min(_round_up(bulk_lo, align), bulk_hi)
        n_full = max(0, bulk_hi - a_start) // chunk

        kern = functools.partial(_ma_rows_kernel, k=k, left=left, seq_len=L,
                                 chunk=chunk, a_start=a_start, n_full=n_full)
        y = pl.pallas_call(
            kern,
            out_shape=jax.ShapeDtypeStruct((B, L, C), x.dtype),
            grid_spec=pltpu.PrefetchScalarGridSpec(
                num_scalar_prefetch=0,
                grid=(B, pl.cdiv(C, c_tile)),
                in_specs=[pl.BlockSpec((1, L, c_tile), lambda b, c: (b, 0, c))],
                out_specs=pl.BlockSpec((1, L, c_tile), lambda b, c: (b, 0, c)),
            ),
            compiler_params=pltpu.CompilerParams(
                dimension_semantics=("parallel", "parallel")),
        )(x)

    # stride > 1: the dense (stride-1) result always has length L and the
    # strided pool is an exact row subsample of it -- avoids strided sublane
    # loads entirely (flagged as a risky/untested path in the review).
    if stride != 1:
        y = y[:, ::stride, :]
    assert y.shape[1] == L_out, (y.shape, L_out)
    return y


def _reference(x, kernel_size, stride=1):
    """Pure-JAX reference matching the PyTorch module."""
    B, L, C = x.shape
    left, end_rep = _pad_amounts(L, kernel_size)
    front = jnp.repeat(x[:, 0:1, :], left, axis=1)
    end = jnp.repeat(x[:, -1:, :], end_rep, axis=1)
    xp = jnp.concatenate([front, x, end], axis=1)
    L_pad = xp.shape[1]
    L_out = (L_pad - kernel_size) // stride + 1
    outs = [jnp.mean(xp[:, t * stride:t * stride + kernel_size, :], axis=1)
            for t in range(L_out)]
    return jnp.stack(outs, axis=1)


if __name__ == "__main__":
    key = jax.random.PRNGKey(0)
    cases = [
        # (B, L, C, kernel_size, stride)
        (2, 96, 8, 25, 1),    # lane-dense path, odd kernel
        (2, 96, 8, 4, 1),     # lane-dense path, even kernel (extra end pad)
        (2, 96, 8, 25, 2),    # stride > 1 (dense compute + exact subsample)
        (2, 64, 256, 7, 1),   # row path: lead rows + full chunks + trail rows
        (1, 40, 256, 25, 1),  # row path, kernel ~ sequence length (all boundary)
    ]
    for (B, L, C, ks, st) in cases:
        key, sub = jax.random.split(key)
        x = jax.random.normal(sub, (B, L, C), dtype=jnp.float32)
        out = jax.block_until_ready(moving_avg(x, ks, st))
        ref = _reference(x, ks, st)
        assert out.shape == ref.shape, (ks, st, out.shape, ref.shape)
        assert jnp.allclose(out, ref, atol=1e-5, rtol=1e-5), (
            "mismatch vs reference", B, L, C, ks, st)
    print("KERNEL_OK")
</pallas_src>

<mosaic_0001>
module attributes {stable_mosaic.version = 11 : i64} {
  func.func @_ma_lanes_kernel(%arg0: i32, %arg1: memref<1x8x96xf32, #tpu.memory_space<vmem>>, %arg2: memref<1x8x96xf32, #tpu.memory_space<vmem>>) attributes {dimension_semantics = [#tpu.dimension_semantics<parallel>], iteration_bounds = array<i64: 2>, scalar_prefetch = 0 : i64, scratch_operands = 0 : i64, tpu.core_type = #tpu.core_type<tc>, window_params = [{transform_indices = @transform_0, window_bounds = array<i64: 1, 8, 96>}, {transform_indices = @transform_1, window_bounds = array<i64: 1, 8, 96>}]} {
    %c0 = arith.constant 0 : index
    %c0_0 = arith.constant 0 : index
    %c0_1 = arith.constant 0 : index
    %0 = vector.load %arg1[%c0, %c0_0, %c0_1] : memref<1x8x96xf32, #tpu.memory_space<vmem>>, vector<1x8x96xf32>
    %1 = vector.shape_cast %0 : vector<1x8x96xf32> to vector<8x96xf32>
    %2 = vector.extract_strided_slice %1 {offsets = [0, 0], sizes = [8, 1], strides = [1, 1]} : vector<8x96xf32> to vector<8x1xf32>
    %3 = vector.shape_cast %2 : vector<8x1xf32> to vector<8x1xf32>
    %4 = vector.broadcast %3 : vector<8x1xf32> to vector<8x12xf32>
    %5 = vector.extract_strided_slice %1 {offsets = [0, 95], sizes = [8, 1], strides = [1, 1]} : vector<8x96xf32> to vector<8x1xf32>
    %6 = vector.shape_cast %5 : vector<8x1xf32> to vector<8x1xf32>
    %7 = vector.broadcast %6 : vector<8x1xf32> to vector<8x12xf32>
    %8 = tpu.concatenate %4, %1, %7 in 1 : vector<8x12xf32>, vector<8x96xf32>, vector<8x12xf32> -> vector<8x120xf32>
    %9 = vector.extract_strided_slice %8 {offsets = [0, 0], sizes = [8, 96], strides = [1, 1]} : vector<8x120xf32> to vector<8x96xf32>
    %10 = vector.extract_strided_slice %8 {offsets = [0, 1], sizes = [8, 96], strides = [1, 1]} : vector<8x120xf32> to vector<8x96xf32>
    %11 = arith.addf %9, %10 : vector<8x96xf32>
    %12 = vector.extract_strided_slice %8 {offsets = [0, 2], sizes = [8, 96], strides = [1, 1]} : vector<8x120xf32> to vector<8x96xf32>
    %13 = arith.addf %11, %12 : vector<8x96xf32>
    %14 = vector.extract_strided_slice %8 {offsets = [0, 3], sizes = [8, 96], strides = [1, 1]} : vector<8x120xf32> to vector<8x96xf32>
    %15 = arith.addf %13, %14 : vector<8x96xf32>
    %16 = vector.extract_strided_slice %8 {offsets = [0, 4], sizes = [8, 96], strides = [1, 1]} : vector<8x120xf32> to vector<8x96xf32>
    %17 = arith.addf %15, %16 : vector<8x96xf32>
    %18 = vector.extract_strided_slice %8 {offsets = [0, 5], sizes = [8, 96], strides = [1, 1]} : vector<8x120xf32> to vector<8x96xf32>
    %19 = arith.addf %17, %18 : vector<8x96xf32>
    %20 = vector.extract_strided_slice %8 {offsets = [0, 6], sizes = [8, 96], strides = [1, 1]} : vector<8x120xf32> to vector<8x96xf32>
    %21 = arith.addf %19, %20 : vector<8x96xf32>
    %22 = vector.extract_strided_slice %8 {offsets = [0, 7], sizes = [8, 96], strides = [1, 1]} : vector<8x120xf32> to vector<8x96xf32>
    %23 = arith.addf %21, %22 : vector<8x96xf32>
    %24 = vector.extract_strided_slice %8 {offsets = [0, 8], sizes = [8, 96], strides = [1, 1]} : vector<8x120xf32> to vector<8x96xf32>
    %25 = arith.addf %23, %24 : vector<8x96xf32>
    %26 = vector.extract_strided_slice %8 {offsets = [0, 9], sizes = [8, 96], strides = [1, 1]} : vector<8x120xf32> to vector<8x96xf32>
    %27 = arith.addf %25, %26 : vector<8x96xf32>
    %28 = vector.extract_strided_slice %8 {offsets = [0, 10], sizes = [8, 96], strides = [1, 1]} : vector<8x120xf32> to vector<8x96xf32>
    %29 = arith.addf %27, %28 : vector<8x96xf32>
    %30 = vector.extract_strided_slice %8 {offsets = [0, 11], sizes = [8, 96], strides = [1, 1]} : vector<8x120xf32> to vector<8x96xf32>
    %31 = arith.addf %29, %30 : vector<8x96xf32>
    %32 = vector.extract_strided_slice %8 {offsets = [0, 12], sizes = [8, 96], strides = [1, 1]} : vector<8x120xf32> to vector<8x96xf32>
    %33 = arith.addf %31, %32 : vector<8x96xf32>
    %34 = vector.extract_strided_slice %8 {offsets = [0, 13], sizes = [8, 96], strides = [1, 1]} : vector<8x120xf32> to vector<8x96xf32>
    %35 = arith.addf %33, %34 : vector<8x96xf32>
    %36 = vector.extract_strided_slice %8 {offsets = [0, 14], sizes = [8, 96], strides = [1, 1]} : vector<8x120xf32> to vector<8x96xf32>
    %37 = arith.addf %35, %36 : vector<8x96xf32>
    %38 = vector.extract_strided_slice %8 {offsets = [0, 15], sizes = [8, 96], strides = [1, 1]} : vector<8x120xf32> to vector<8x96xf32>
    %39 = arith.addf %37, %38 : vector<8x96xf32>
    %40 = vector.extract_strided_slice %8 {offsets = [0, 16], sizes = [8, 96], strides = [1, 1]} : vector<8x120xf32> to vector<8x96xf32>
    %41 = arith.addf %39, %40 : vector<8x96xf32>
    %42 = vector.extract_strided_slice %8 {offsets = [0, 17], sizes = [8, 96], strides = [1, 1]} : vector<8x120xf32> to vector<8x96xf32>
    %43 = arith.addf %41, %42 : vector<8x96xf32>
    %44 = vector.extract_strided_slice %8 {offsets = [0, 18], sizes = [8, 96], strides = [1, 1]} : vector<8x120xf32> to vector<8x96xf32>
    %45 = arith.addf %43, %44 : vector<8x96xf32>
    %46 = vector.extract_strided_slice %8 {offsets = [0, 19], sizes = [8, 96], strides = [1, 1]} : vector<8x120xf32> to vector<8x96xf32>
    %47 = arith.addf %45, %46 : vector<8x96xf32>
    %48 = vector.extract_strided_slice %8 {offsets = [0, 20], sizes = [8, 96], strides = [1, 1]} : vector<8x120xf32> to vector<8x96xf32>
    %49 = arith.addf %47, %48 : vector<8x96xf32>
    %50 = vector.extract_strided_slice %8 {offsets = [0, 21], sizes = [8, 96], strides = [1, 1]} : vector<8x120xf32> to vector<8x96xf32>
    %51 = arith.addf %49, %50 : vector<8x96xf32>
    %52 = vector.extract_strided_slice %8 {offsets = [0, 22], sizes = [8, 96], strides = [1, 1]} : vector<8x120xf32> to vector<8x96xf32>
    %53 = arith.addf %51, %52 : vector<8x96xf32>
    %54 = vector.extract_strided_slice %8 {offsets = [0, 23], sizes = [8, 96], strides = [1, 1]} : vector<8x120xf32> to vector<8x96xf32>
    %55 = arith.addf %53, %54 : vector<8x96xf32>
    %56 = vector.extract_strided_slice %8 {offsets = [0, 24], sizes = [8, 96], strides = [1, 1]} : vector<8x120xf32> to vector<8x96xf32>
    %57 = arith.addf %55, %56 : vector<8x96xf32>
    %cst = arith.constant 4.000000e-02 : f32
    %58 = vector.broadcast %cst : f32 to vector<8x96xf32>
    %59 = arith.mulf %57, %58 : vector<8x96xf32>
    %c0_2 = arith.constant 0 : index
    %c0_3 = arith.constant 0 : index
    %c0_4 = arith.constant 0 : index
    %60 = vector.load %arg2[%c0_2, %c0_3, %c0_4] : memref<1x8x96xf32, #tpu.memory_space<vmem>>, vector<1x8x96xf32>
    %61 = vector.shape_cast %60 : vector<1x8x96xf32> to vector<8x96xf32>
    %62 = vector.shape_cast %59 : vector<8x96xf32> to vector<1x8x96xf32>
    tpu.vector_store %arg2[%c0_2, %c0_3, %c0_4], %62 {strides = array<i32>} : memref<1x8x96xf32, #tpu.memory_space<vmem>>, vector<1x8x96xf32>,
    return
  }
  func.func @transform_0(%arg0: i32) -> (i32, i32, i32) {
    %c0_i32 = arith.constant 0 : i32
    %c0_i32_0 = arith.constant 0 : i32
    %c0_i32_1 = arith.constant 0 : i32
    return %arg0, %c0_i32, %c0_i32_0 : i32, i32, i32
  }
  func.func @transform_1(%arg0: i32) -> (i32, i32, i32) {
    %c0_i32 = arith.constant 0 : i32
    %c0_i32_0 = arith.constant 0 : i32
    %c0_i32_1 = arith.constant 0 : i32
    return %arg0, %c0_i32, %c0_i32_0 : i32, i32, i32
  }
}

</mosaic_0001>

<bundles_post_ra>
// kernel: tpu_custom_call.1
= control target key start
LH: loop header
LB: loop body
LE: loop exit
PB: predicated region body
PF: predicated region fallthrough
CT: control target
= control target key end

     0   :  { %6 = vsyncpa [#allocation3], 0  ;;  %s722_s0 = inlined_call_operand.hbm [shape: f32[2,8,96], index: 0, kind: input, shape index: {}]   ;;  %s723_s1 = inlined_call_operand.hbm [shape: f32[2,8,96], index: 1, kind: output, shape index: {}]  }
   0x1   :  { %8 = vsyncpa [#allocation3 + $0x1], 0 }
   0x2   :  { %9 = vsyncpa [#allocation4], 0 }
   0x3   :  { %11 = vsyncpa [#allocation4 + $0x1], 0  ;;  %s557_s6 = smov 0   ;;  %s559_s7 = smov 0  }
   0x4   :  { %s561_s8 = smov 0   ;;  %s563_s9 = smov 0  }
   0x5 LB: > { %s578_s10 = sadd.s32 4294967295, %s516_s9   ;;  %s333_s11 = sadd.s32 4294967294, %s516_s9   ;;  %s516_s9 = sphi %s563_s9, %s738_s9   ;;  %s512_s8 = sphi %s561_s8, %s737_s8   ;;  %s508_s7 = sphi %s559_s7, %s736_s7   ;;  %s504_s6 = sphi %s557_s6, %s735_s6  }
   0x6   : > { %s582_s12 = sadd.s32 1, %s516_s9   ;;  %s24_s13 = sadd.s32 1, %s512_s8 }
   0x7   : > { %s21_s14 = ssub.s32 %s516_s9, %s582_s12  ;;  %p31_p0 = scmp.ne.s32.totalorder %s512_s8, %s508_s7 }
   0x8   : > { %p22_p1 = scmp.eq.s32.totalorder %s21_s14, 0  ;;  %p32_p2 = scmp.eq.s32.totalorder %s516_s9, 0 }
   0x9   : > { %p37_p3 = scmp.ne.s32.totalorder %s508_s7, %s504_s6  ;;  %p38_p4 = scmp.eq.s32.totalorder %s578_s10, 0 }
   0xa   : > { %s594_s15 = scalar_select %p22_p1, %s512_s8, %s24_s13  }
   0xb   : > { %p596_p5 = por %p32_p2, %p31_p0  ;;  %p600_p6 = por %p38_p4, %p37_p3 }
   0xc   : > { %p61_p7 = scmp.eq.s32.totalorder %s578_s10, 1  ;;  %p67_p8 = scmp.eq.s32.totalorder %s333_s11, 1 }
   0xd   : > { %p357_p10 = scmp.lt.s32.totalorder %s516_s9, 2  ;;  %s87_s20 = sand.u32 1, %s512_s8  }
   0xe   : > { %p607_p11 = por %p61_p7, %p31_p0  ;;  %p611_p12 = por %p67_p8, %p37_p3 }
   0xf   : > { %s337_s21 = sshll.u32 %s516_s9, 7  ;;  %s336_s22 = sshll.u32 %s87_s20, 3 }
  0x10   : > { %s727_s18 = scalar_select %p607_p11, 1, 0 }
  0x11   : > { %s728_s19 = scalar_select %p611_p12, 1, 0 }
  0x12   : > { %s620_s25 = scalar_lea.hbm %s722_s0, %s337_s21  ;;  %s91_s26 = scalar_lea.vmem [#allocation2], %s336_s22 }
  0x13   : > { %s98_s27 = sshll.u32 %s91_s26, 4  ;;  %p624_p13 = pnand %p357_p10, %p596_p5  ;;  %s628_s27 = int_to_ptr.vmem [resolvable:$true] %s98_s27 }
  0x14   : > { %s88_s29 = scalar_lea.sflag [#allocation3], %s87_s20  ;;  %s420_s30 = scalar_lea.hbm %s620_s25, 128 }
  0x15   : > { %p421_p2 = scmp.ne.s32.totalorder %s620_s25, %s420_s30  ;;  %p422_p3 = pneg %p624_p13 }
  0x16   : > { %s425_s4 = scalar_lea.hbm %s722_s0, 256  ;;  %p426_p5 = scmp.lt.u32.totalorder %s620_s25, %s722_s0 }
  0x17   : > { %p423_p4 = pnand %p422_p3, %p421_p2  ;;  %p427_p8 = scmp.lt.u32.totalorder %s425_s4, %s420_s30 }
  0x18   : > { %p429_p9 = scmp.lt.u32.totalorder %s420_s30, %s620_s25 }
  0x19   : > { %p424_p7 = pneg %p423_p4  ;;  %p428_p10 = por %p427_p8, %p426_p5 }
  0x1b   : > { %p430_p0 = por %p429_p9, %p428_p10 }
  0x1d   : > { %p431_p1 = pnand %p430_p0, %p424_p7 }
  0x1f   : > { %434 = shalt.err (!%p431_p1)
}
  0x20   : > { %s435_s13 = scalar_lea.vmem %s628_s27, 128  ;;  %s518_s14 = smov [#allocation2]  }
  0x21   : > { %p436_p2 = scmp.ne.s32.totalorder %s628_s27, %s435_s13  ;;  %s440_s16 = sshll.u32 %s518_s14, 4  ;;  %s441_s16 = int_to_ptr.vmem [resolvable:$false] %s440_s16 }
  0x22   : > { %s442_s20 = scalar_lea.vmem %s441_s16, 256  ;;  %p443_p11 = scmp.lt.s32.totalorder %s628_s27, %s441_s16 }
  0x23   : > { %p438_p4 = pnand %p436_p2, %p422_p3  ;;  %p444_p5 = scmp.lt.s32.totalorder %s442_s20, %s435_s13 }
  0x25   : > { %p439_p12 = pneg %p438_p4  ;;  %p445_p8 = por %p444_p5, %p443_p11 }
  0x27   : > { %p446_p9 = pnand %p445_p8, %p439_p12 }
  0x29   : > { %449 = shalt.err (!%p446_p9)
}
  0x2a   : > { %352 = dma.hbm_to_vmem [thread:$0]  (!%p624_p13), %s620_s25, 128, %s628_s27, %s88_s29  }
  0x2b   : > { %p730_p0 = scmp.lt.s32.totalorder %s516_s9, 3  ;;  %p731_p1 = scmp.ge.s32.totalorder %s516_s9, 1 }
  0x2d   : > { %p104_p3 = pnand %p731_p1, %p730_p0 }
  0x2e   : > { %s662_s21 = sand.u32 (!%p104_p3), 1, %s508_s7  }
  0x2f   : > { %107 = sbr.rel (%p104_p3) target bundleno = 372 (0x174), region = 24  ;;  %s339_s22 = sshll.u32 (!%p104_p3), %s662_s21, 3 }
  0x30   : > { %s110_s23 = scalar_lea.sflag (!%p104_p3), [#allocation3], %s662_s21  ;;  %s113_s24 = scalar_lea.vmem (!%p104_p3), [#allocation2], %s339_s22 }
  0x36   : > { %495 = dma.done.wait (%p600_p6), %s110_s23, 128  }
  0x37   : > { %497 = vsyncadd (%p600_p6), %s110_s23, 4294967168  ;;  %v519_v0 = vmov 0   ;;  %v132_v1 = vld [vmem:[%s113_s24] sm:$0xff]  ;;  %s520_s25 = smov 12   ;;  %v521_v2 = vmov 95   ;;  %vm145_vm0 = vcmask 97280  }
  0x38   : > { %418 = vset.pattern.permute.xlu0 %v519_v0  ;;  %142 = vrot.lane.b32.xlu1 %v132_v1, %s520_s25  ;;  %vm147_vm1 = vcmask 883712   ;;  %s522_s26 = smov 125   ;;  %s523_s17 = smov 127   ;;  %vm247_vm2 = vcmask 785408  }
  0x39   : > { %135 = vperm.xlu0 %418, %v132_v1   ;;  %s524_s27 = smov 123   ;;  %s525_s28 = smov 126  }
  0x3a   : > { %s526_s29 = smov 121   ;;  %s527_s30 = smov 124  }
  0x3b   : > { %s528_s2 = smov 119   ;;  %s529_s3 = smov 122  }
  0x3c   : > { %s530_s4 = smov 117   ;;  %s531_s5 = smov 120  }
  0x3d   : > { %419 = vset.pattern.permute.xlu0 %v521_v2  ;;  %s532_s11 = smov 115   ;;  %s533_s13 = smov 118  }
  0x3e   : > { %139 = vperm.xlu0 %419, %v132_v1   ;;  %s534_s14 = smov 113   ;;  %s535_s16 = smov 116  }
  0x3f   : > { %s536_s20 = smov 111   ;;  %s537_s23 = smov 114  }
  0x40   : > { %s538_s24 = smov 109   ;;  %s539_s25 = smov 112  }
  0x41   : > { %p732_p11 = scmp.ne.s32.totalorder %s727_s18, 0 }
  0xaa   : > { %v143_v4 = vpop.permute.xlu1 %142 }
  0xb8   : > { %v136_v3 = vpop.permute.xlu0 %135 }
  0xb9   : > { %v146_v5 = vsel %vm145_vm0, %v136_v3, %v143_v4 }
  0xbd   : > { %v140_v6 = vpop.permute.xlu0 %139 }
  0xbe   : > { %v148_v7 = vsel %vm147_vm1, %v146_v5, %v140_v6 }
  0xbf   : > { %158 = vrot.lane.b32.xlu0 %v148_v7, %s522_s26  ;;  %150 = vrot.lane.b32.xlu1 %v148_v7, %s523_s17  ;;  %s540_s26 = smov 107   ;;  %s541_s17 = smov 110  }
  0xc3   : > { %166 = vrot.lane.b32.xlu0 %v148_v7, %s524_s27  ;;  %154 = vrot.lane.b32.xlu1 %v148_v7, %s525_s28  ;;  %s542_s27 = smov 105   ;;  %s543_s28 = smov 108  }
  0xc7   : > { %174 = vrot.lane.b32.xlu0 %v148_v7, %s526_s29  ;;  %162 = vrot.lane.b32.xlu1 %v148_v7, %s527_s30  ;;  %s544_s29 = smov 106   ;;  %s545_s30 = smov 104  }
  0xcb   : > { %182 = vrot.lane.b32.xlu0 %v148_v7, %s528_s2  ;;  %170 = vrot.lane.b32.xlu1 %v148_v7, %s529_s3  ;;  %s342_s2 = sshll.u32 %s578_s10, 7  ;;  %s131_s3 = scalar_lea.vmem [#allocation5], %s339_s22 }
  0xcc   : > { %s546_s10 = smov [#allocation5]  }
  0xcd   : > { %s454_s22 = sshll.u32 %s546_s10, 4  ;;  %s455_s22 = int_to_ptr.vmem [resolvable:$false] %s454_s22 }
  0xcf   : > { %190 = vrot.lane.b32.xlu0 %v148_v7, %s530_s4  ;;  %178 = vrot.lane.b32.xlu1 %v148_v7, %s531_s5  ;;  %s263_s4 = sshll.u32 %s131_s3, 4  ;;  %s680_s4 = int_to_ptr.vmem [resolvable:$true] %s263_s4 }
  0xd0   : > { %p457_p7 = scmp.lt.s32.totalorder %s680_s4, %s455_s22 }
  0xd3   : > { %198 = vrot.lane.b32.xlu0 %v148_v7, %s532_s11  ;;  %186 = vrot.lane.b32.xlu1 %v148_v7, %s533_s13  ;;  %s678_s13 = scalar_lea.hbm %s723_s1, %s342_s2 }
  0xd7   : > { %206 = vrot.lane.b32.xlu0 %v148_v7, %s534_s14  ;;  %194 = vrot.lane.b32.xlu1 %v148_v7, %s535_s16  ;;  %s250_s14 = scalar_lea.sflag [#allocation4], %s662_s21  ;;  %s450_s16 = scalar_lea.vmem %s680_s4, 128 }
  0xd8   : > { %p451_p6 = scmp.ne.s32.totalorder %s680_s4, %s450_s16 }
  0xda   : > { %p452_p12 = pnand %p451_p6, %p732_p11 }
  0xdb   : > { %214 = vrot.lane.b32.xlu0 %v148_v7, %s536_s20  ;;  %202 = vrot.lane.b32.xlu1 %v148_v7, %s537_s23  ;;  %s456_s20 = scalar_lea.vmem %s455_s22, 256 }
  0xdc   : > { %p453_p13 = pneg %p452_p12  ;;  %p458_p10 = scmp.lt.s32.totalorder %s456_s20, %s450_s16 }
  0xde   : > { %p459_p2 = por %p458_p10, %p457_p7 }
  0xdf   : > { %222 = vrot.lane.b32.xlu0 %v148_v7, %s538_s24  ;;  %210 = vrot.lane.b32.xlu1 %v148_v7, %s539_s25 }
  0xe0   : > { %p460_p4 = pnand %p459_p2, %p453_p13 }
  0xe3   : > { %230 = vrot.lane.b32.xlu0 %v148_v7, %s540_s26  ;;  %218 = vrot.lane.b32.xlu1 %v148_v7, %s541_s17 }
  0xe7   : > { %238 = vrot.lane.b32.xlu0 %v148_v7, %s542_s27  ;;  %226 = vrot.lane.b32.xlu1 %v148_v7, %s543_s28 }
  0xeb   : > { %234 = vrot.lane.b32.xlu1 %v148_v7, %s544_s29 }
  0xef   : > { %242 = vrot.lane.b32.xlu1 %v148_v7, %s545_s30 }
 0x131   : > { %v159_v8 = vpop.permute.xlu0 %158  ;;  %v151_v9 = vpop.permute.xlu1 %150 }
 0x132   : > { %v153_v10 = vadd.f32 %v151_v9, %v148_v7 }
 0x135   : > { %v167_v11 = vpop.permute.xlu0 %166  ;;  %v155_v12 = vpop.permute.xlu1 %154 }
 0x136   : > { %v157_v13 = vadd.f32 %v155_v12, %v153_v10 }
 0x138   : > { %v161_v14 = vadd.f32 %v159_v8, %v157_v13 }
 0x139   : > { %v175_v15 = vpop.permute.xlu0 %174  ;;  %v163_v16 = vpop.permute.xlu1 %162 }
 0x13a   : > { %v165_v17 = vadd.f32 %v163_v16, %v161_v14 }
 0x13c   : > { %v169_v18 = vadd.f32 %v167_v11, %v165_v17 }
 0x13d   : > { %v183_v19 = vpop.permute.xlu0 %182  ;;  %v171_v20 = vpop.permute.xlu1 %170 }
 0x13e   : > { %v173_v21 = vadd.f32 %v171_v20, %v169_v18 }
 0x140   : > { %v177_v22 = vadd.f32 %v175_v15, %v173_v21 }
 0x141   : > { %v191_v23 = vpop.permute.xlu0 %190  ;;  %v179_v24 = vpop.permute.xlu1 %178 }
 0x142   : > { %v181_v25 = vadd.f32 %v179_v24, %v177_v22 }
 0x144   : > { %v185_v26 = vadd.f32 %v183_v19, %v181_v25 }
 0x145   : > { %v199_v27 = vpop.permute.xlu0 %198  ;;  %v187_v28 = vpop.permute.xlu1 %186 }
 0x146   : > { %v189_v29 = vadd.f32 %v187_v28, %v185_v26 }
 0x148   : > { %v193_v30 = vadd.f32 %v191_v23, %v189_v29 }
 0x149   : > { %v207_v31 = vpop.permute.xlu0 %206  ;;  %v195_v32 = vpop.permute.xlu1 %194 }
 0x14a   : > { %v197_v33 = vadd.f32 %v195_v32, %v193_v30 }
 0x14c   : > { %v201_v34 = vadd.f32 %v199_v27, %v197_v33 }
 0x14d   : > { %v215_v35 = vpop.permute.xlu0 %214  ;;  %v203_v36 = vpop.permute.xlu1 %202 }
 0x14e   : > { %v205_v37 = vadd.f32 %v203_v36, %v201_v34 }
 0x150   : > { %v209_v38 = vadd.f32 %v207_v31, %v205_v37 }
 0x151   : > { %v211_v39 = vpop.permute.xlu1 %210  ;;  %v223_v41 = vpop.permute.xlu0 %222 }
 0x152   : > { %v213_v40 = vadd.f32 %v211_v39, %v209_v38 }
 0x154   : > { %v217_v42 = vadd.f32 %v215_v35, %v213_v40 }
 0x155   : > { %v219_v43 = vpop.permute.xlu1 %218  ;;  %v231_v46 = vpop.permute.xlu0 %230 }
 0x156   : > { %v221_v44 = vadd.f32 %v219_v43, %v217_v42 }
 0x158   : > { %v225_v45 = vadd.f32 %v223_v41, %v221_v44 }
 0x159   : > { %v227_v47 = vpop.permute.xlu1 %226  ;;  %v239_v52 = vpop.permute.xlu0 %238 }
 0x15a   : > { %v229_v48 = vadd.f32 %v227_v47, %v225_v45 }
 0x15c   : > { %v233_v49 = vadd.f32 %v231_v46, %v229_v48 }
 0x15d   : > { %v235_v50 = vpop.permute.xlu1 %234 }
 0x15e   : > { %v237_v51 = vadd.f32 %v235_v50, %v233_v49 }
 0x160   : > { %v241_v53 = vadd.f32 %v239_v52, %v237_v51 }
 0x161   : > { %v243_v54 = vpop.permute.xlu1 %242 }
 0x162   : > { %v245_v55 = vadd.f32 %v243_v54, %v241_v53 }
 0x164   : > { %v246_v56 = vmul.f32 0.04, %v245_v55 }
 0x166   : > { %248 = vst.msk [vmem:[%s131_s3] sm:$0xff] %vm247_vm2, %v246_v56 }
 0x167   : > { %463 = shalt.err (!%p460_p4)
}
 0x168   : > { %s464_s21 = scalar_lea.hbm %s678_s13, 128  ;;  %s468_s25 = scalar_lea.hbm %s723_s1, 256 }
 0x169   : > { %p465_p5 = scmp.ne.s32.totalorder %s678_s13, %s464_s21  ;;  %p469_p0 = scmp.lt.u32.totalorder %s678_s13, %s723_s1 }
 0x16a   : > { %p470_p1 = scmp.lt.u32.totalorder %s468_s25, %s464_s21  ;;  %p472_p6 = scmp.lt.u32.totalorder %s464_s21, %s678_s13 }
 0x16b   : > { %p466_p8 = pnand %p465_p5, %p732_p11 }
 0x16c   : > { %p471_p3 = por %p470_p1, %p469_p0 }
 0x16d   : > { %p467_p9 = pneg %p466_p8 }
 0x16e   : > { %p473_p12 = por %p472_p6, %p471_p3 }
 0x170   : > { %p474_p13 = pnand %p473_p12, %p467_p9 }
 0x172   : > { %477 = shalt.err (!%p474_p13)
}
 0x173   : > { %347 = dma.vmem_to_hbm [thread:$0]  (%p732_p11), %s680_s4, 128, %s678_s13, %s250_s14  }
 0x174 PF: > { %s275_s27 = sand.u32 1, %s504_s6   ;;  %p733_p7 = scmp.ne.s32.totalorder %s728_s19, 0 }
 0x175   : > { %p734_p10 = scmp.ge.s32.totalorder %s516_s9, 2  ;;  %s276_s28 = scalar_lea.sflag [#allocation4], %s275_s27 }
 0x177   : > { %p354_p2 = pnand %p734_p10, %p733_p7 }
 0x179   : > { %499 = dma.done.wait (!%p354_p2), %s276_s28, 128  }
 0x17a   : > { %501 = vsyncadd (!%p354_p2), %s276_s28, 4294967168  ;;  %p14_p4 = scmp.ge.s32.totalorder %s582_s12, 4   ;;  %s735_s6 = smov %s508_s7 }
 0x17b   : > { %s736_s7 = smov %s512_s8  ;;  %s737_s8 = smov %s594_s15 }
 0x17c   : > { %s738_s9 = smov %s582_s12  ;;  %16 = sbr.rel (!%p14_p4) target bundleno = 5 (0x5), region = 69 }
 0x183   :  { %281 = vsyncpa [#allocation3], 1 }
 0x184   :  { %283 = vsyncpa [#allocation3 + $0x1], 1 }
 0x185   :  { %284 = vsyncpa [#allocation4], 1 }
 0x186   :  { %286 = vsyncpa [#allocation4 + $0x1], 1 }

</bundles_post_ra>
